<compile_context>
chip_gen: v6e
topology: v6e:2x2x1
jax: 0.10.0
libtpu: 0.0.40
codegen_flags: <defaults>
</compile_context>

<pallas_src>
import jax
import jax.numpy as jnp
from jax.experimental import pallas as pl
from jax.experimental.pallas import tpu as pltpu


# Below this many total bytes the pallas_call launch overhead (several µs)
# dwarfs the transfer time, so the identity path returns the inputs directly.
_KERNEL_BYTES_THRESHOLD = 1 << 20  # 1 MiB


def _dma_passthrough_kernel(dyn_in, stat_in, dyn_out, stat_out, sem):
    # Pure DMA-engine copies (HBM -> HBM).  The TensorCore only issues the DMA
    # descriptors; no vld/vst bundle slots, no VMEM staging, no vreg padding
    # for the narrow 16/32-wide last dims.  Start both copies before waiting
    # on either so they overlap fully on the DMA engines.
    dyn_cp = pltpu.make_async_copy(dyn_in, dyn_out, sem.at[0])
    stat_cp = pltpu.make_async_copy(stat_in, stat_out, sem.at[1])
    dyn_cp.start()
    stat_cp.start()
    dyn_cp.wait()
    stat_cp.wait()


def _dma_identity_call(dynamic_input, static_input):
    """On-device bit-exact identity of both inputs via HBM->HBM async DMA."""
    n, t, c = dynamic_input.shape
    ns, cs = static_input.shape

    bytes_moved = (
        2 * n * t * c * dynamic_input.dtype.itemsize  # read + write
        + 2 * ns * cs * static_input.dtype.itemsize
    )

    return pl.pallas_call(
        _dma_passthrough_kernel,
        out_shape=(
            jax.ShapeDtypeStruct((n, t, c), dynamic_input.dtype),
            jax.ShapeDtypeStruct((ns, cs), static_input.dtype),
        ),
        in_specs=[
            pl.BlockSpec(memory_space=pl.ANY),
            pl.BlockSpec(memory_space=pl.ANY),
        ],
        out_specs=(
            pl.BlockSpec(memory_space=pl.ANY),
            pl.BlockSpec(memory_space=pl.ANY),
        ),
        scratch_shapes=[pltpu.SemaphoreType.DMA((2,))],
        cost_estimate=pl.CostEstimate(
            flops=0, transcendentals=0, bytes_accessed=bytes_moved
        ),
    )(dynamic_input, static_input)


def identity_passthrough(dynamic_input, static_input, *, force_kernel=False):
    """Opt-in debug/test path: bit-exact identity of both inputs.

    Below a size threshold (and unless `force_kernel=True`) this returns the
    inputs unchanged — no pallas_call, no copy — since launch overhead would
    dominate by orders of magnitude.  Above the threshold (or when forced) it
    runs the HBM->HBM DMA kernel.
    """
    n, t, c = dynamic_input.shape
    ns, cs = static_input.shape
    assert n == ns, "batch dims of dynamic and static inputs must match"

    total_bytes = (
        n * t * c * dynamic_input.dtype.itemsize
        + ns * cs * static_input.dtype.itemsize
    )
    if not force_kernel and total_bytes < _KERNEL_BYTES_THRESHOLD:
        # Identity is free: no device work at all.
        return dynamic_input, static_input

    return _dma_identity_call(dynamic_input, static_input)


class Seq2SeqDecoder:
    """JAX/Pallas mirror of the abstract PyTorch Seq2SeqDecoder.

    The module has no parameters and its forward returns None.  forward()
    performs NO device work and has NO Python side effects (jit-safe).  The
    on-device pass-through is available explicitly via `debug_identity`.
    """

    def __init__(self, **kwargs):
        # Abstract base: no parameters to initialize.
        pass

    def forward(self, dynamic_input, static_input):
        # Abstract forward: returns None, exactly like the PyTorch module.
        return None

    __call__ = forward

    def debug_identity(self, dynamic_input, static_input, *, force_kernel=False):
        """Debug/test helper: bit-exact identity of both inputs."""
        return identity_passthrough(
            dynamic_input, static_input, force_kernel=force_kernel
        )


if __name__ == "__main__":
    key = jax.random.PRNGKey(0)
    k1, k2 = jax.random.split(key)

    batch, seq_len, num_dyn_feat, num_stat_feat = 2, 8, 32, 16
    dynamic_input = jax.random.normal(
        k1, (batch, seq_len, num_dyn_feat), jnp.float32
    )
    static_input = jax.random.normal(k2, (batch, num_stat_feat), jnp.float32)

    # 1) Tiny-shape fast path: no pallas_call, inputs returned as-is.
    dyn_fast, stat_fast = identity_passthrough(dynamic_input, static_input)
    assert dyn_fast is dynamic_input
    assert stat_fast is static_input

    # 2) Forced kernel path: run the HBM->HBM DMA identity kernel once on
    #    device and block on its outputs.
    dyn_out, stat_out = identity_passthrough(
        dynamic_input, static_input, force_kernel=True
    )
    dyn_out = jax.block_until_ready(dyn_out)
    stat_out = jax.block_until_ready(stat_out)

    # Bit-exact identity semantics check.
    assert dyn_out.shape == dynamic_input.shape
    assert dyn_out.dtype == dynamic_input.dtype
    assert stat_out.shape == static_input.shape
    assert stat_out.dtype == static_input.dtype
    assert bool(jnp.array_equal(dyn_out, dynamic_input))
    assert bool(jnp.array_equal(stat_out, static_input))

    # 3) Module forward: no device work, returns None (PyTorch parity).
    decoder = Seq2SeqDecoder()
    assert decoder(dynamic_input, static_input) is None

    # 4) Explicit debug helper (fast path + forced kernel path).
    d_f, s_f = decoder.debug_identity(dynamic_input, static_input)
    assert d_f is dynamic_input and s_f is static_input
    d_k, s_k = jax.block_until_ready(
        decoder.debug_identity(dynamic_input, static_input, force_kernel=True)
    )
    assert bool(jnp.array_equal(d_k, dynamic_input))
    assert bool(jnp.array_equal(s_k, static_input))

    print("KERNEL_OK")
</pallas_src>

<mosaic_0001>
module attributes {stable_mosaic.version = 11 : i64} {
  func.func @_dma_passthrough_kernel(%arg0: memref<2x8x32xf32, #tpu.memory_space<any>>, %arg1: memref<2x16xf32, #tpu.memory_space<any>>, %arg2: memref<2x8x32xf32, #tpu.memory_space<any>>, %arg3: memref<2x16xf32, #tpu.memory_space<any>>, %arg4: memref<2x!tpu.dma_semaphore, #tpu.memory_space<semaphore_mem>>) attributes {dimension_semantics = [], scalar_prefetch = 0 : i64, scratch_operands = 1 : i64, tpu.core_type = #tpu.core_type<tc>} {
    %c0_i32 = arith.constant 0 : i32
    %0 = tpu.memref_slice %arg4[%c0_i32] : memref<2x!tpu.dma_semaphore, #tpu.memory_space<semaphore_mem>> -> memref<1x!tpu.dma_semaphore, #tpu.memory_space<semaphore_mem>>
    %1 = tpu.memref_squeeze %0 : memref<1x!tpu.dma_semaphore, #tpu.memory_space<semaphore_mem>> -> memref<!tpu.dma_semaphore, #tpu.memory_space<semaphore_mem>>
    tpu.enqueue_dma source(%arg0 : memref<2x8x32xf32, #tpu.memory_space<any>>) target(%arg2 : memref<2x8x32xf32, #tpu.memory_space<any>>) target_semaphore(%1 : memref<!tpu.dma_semaphore, #tpu.memory_space<semaphore_mem>>)
    %c1_i32 = arith.constant 1 : i32
    %2 = tpu.memref_slice %arg4[%c1_i32] : memref<2x!tpu.dma_semaphore, #tpu.memory_space<semaphore_mem>> -> memref<1x!tpu.dma_semaphore, #tpu.memory_space<semaphore_mem>>
    %3 = tpu.memref_squeeze %2 : memref<1x!tpu.dma_semaphore, #tpu.memory_space<semaphore_mem>> -> memref<!tpu.dma_semaphore, #tpu.memory_space<semaphore_mem>>
    tpu.enqueue_dma source(%arg1 : memref<2x16xf32, #tpu.memory_space<any>>) target(%arg3 : memref<2x16xf32, #tpu.memory_space<any>>) target_semaphore(%3 : memref<!tpu.dma_semaphore, #tpu.memory_space<semaphore_mem>>)
    %c0_i32_0 = arith.constant 0 : i32
    %4 = tpu.memref_slice %arg4[%c0_i32_0] : memref<2x!tpu.dma_semaphore, #tpu.memory_space<semaphore_mem>> -> memref<1x!tpu.dma_semaphore, #tpu.memory_space<semaphore_mem>>
    %5 = tpu.memref_squeeze %4 : memref<1x!tpu.dma_semaphore, #tpu.memory_space<semaphore_mem>> -> memref<!tpu.dma_semaphore, #tpu.memory_space<semaphore_mem>>
    tpu.wait_dma2 semaphore(%5 : memref<!tpu.dma_semaphore, #tpu.memory_space<semaphore_mem>>) src(%arg0 : memref<2x8x32xf32, #tpu.memory_space<any>>) dst(%arg2 : memref<2x8x32xf32, #tpu.memory_space<any>>)
    %c1_i32_1 = arith.constant 1 : i32
    %6 = tpu.memref_slice %arg4[%c1_i32_1] : memref<2x!tpu.dma_semaphore, #tpu.memory_space<semaphore_mem>> -> memref<1x!tpu.dma_semaphore, #tpu.memory_space<semaphore_mem>>
    %7 = tpu.memref_squeeze %6 : memref<1x!tpu.dma_semaphore, #tpu.memory_space<semaphore_mem>> -> memref<!tpu.dma_semaphore, #tpu.memory_space<semaphore_mem>>
    tpu.wait_dma2 semaphore(%7 : memref<!tpu.dma_semaphore, #tpu.memory_space<semaphore_mem>>) src(%arg1 : memref<2x16xf32, #tpu.memory_space<any>>) dst(%arg3 : memref<2x16xf32, #tpu.memory_space<any>>)
    return
  }
}

</mosaic_0001>

<bundles_post_ra>
// kernel: tpu_custom_call.1
= control target key start
LH: loop header
LB: loop body
LE: loop exit
PB: predicated region body
PF: predicated region fallthrough
CT: control target
= control target key end

     0   :  { %s54_s12 = smov [#allocation2]   ;;  %s55_s13 = smov 131072   ;;  %s90_s0 = inlined_call_operand.hbm [shape: f32[2,8,32], index: 0, kind: input, shape index: {}]   ;;  %s91_s2 = inlined_call_operand.hbm [shape: f32[2,8,32], index: 2, kind: output, shape index: {0}]   ;;  %s92_s1 = inlined_call_operand.hbm [shape: f32[2,16], index: 1, kind: input, shape index: {}]   ;;  %s93_s3 = inlined_call_operand.hbm [shape: f32[2,16], index: 3, kind: output, shape index: {1}]  }
   0x1   :  { %s56_s14 = smov 0   ;;  %s57_s19 = smov [#allocation2 + $0x1]  }
   0x2   :  { %15 = dma.general %s90_s0, 256, %s91_s2, %s54_s12, %s55_s13, [#allocation4], %s56_s14, 0  }
   0x3   :  { %23 = dma.general %s92_s1, 32, %s93_s3, %s57_s19, %s55_s13, [#allocation6], %s56_s14, 0  }
   0x4   :  { %50 = dma.done.wait [#allocation2], 256 }
   0x5   :  { %51 = vsyncadd [#allocation2], 4294967040 }
   0x6   :  { %52 = dma.done.wait [#allocation2 + $0x1], 32 }
   0x7   :  { %53 = vsyncadd [#allocation2 + $0x1], 4294967264 }
   0x8   :  { %31 = vsyncmov [#allocation2] }
   0xb   :  { %s32_s24 = vpop.sfrf %31 }
   0xc   :  { %p44_p0 = scmp.ne.s32.totalorder %s32_s24, 0 }
   0xe   :  { %36 = shalt.err (%p44_p0)  }
   0xf   :  { %38 = vsyncmov [#allocation2 + $0x1] }
  0x12   :  { %s39_s25 = vpop.sfrf %38 }
  0x13   :  { %p45_p1 = scmp.ne.s32.totalorder %s39_s25, 0 }
  0x15   :  { %43 = shalt.err (%p45_p1)  }

</bundles_post_ra>
